<compile_context>
chip_gen: v7x
topology: tpu7x:2x2x1
jax: 0.10.0
libtpu: 0.0.40
codegen_flags: <defaults>
</compile_context>

<pallas_src>
import functools

import jax
import jax.numpy as jnp
from jax import lax
from jax.experimental import pallas as pl
from jax.experimental.pallas import tpu as pltpu


def _round_up(x, m):
    return ((x + m - 1) // m) * m


def _user_movie_kernel(fc_ref, ids_ref, ut_ref, mt_ref, out_ref):
    # fc_ref : (2,)  f32  SMEM  -> [w, b] of the 1x1 Linear
    # ids_ref: (2, TB) i32 VMEM -> row 0 = user ids, row 1 = movie ids
    # ut_ref : (D, NU_pad) bf16 VMEM (whole table, resident, single-buffered)
    # mt_ref : (D, NM_pad) bf16 VMEM
    # out_ref: (1, TB) f32 VMEM (lane-dense output slab)
    ids = ids_ref[...]                                   # (2, TB)
    uid = ids[0:1, :]                                    # (1, TB)
    mid = ids[1:2, :]                                    # (1, TB)
    nu = ut_ref.shape[1]
    nm = mt_ref.shape[1]
    tb = ids.shape[1]

    # Fused embedding gather: bf16 one-hot (0/1 exact in bf16) built from
    # iota + compare (VPU) and pushed through the otherwise-idle MXU.
    oh_u = (lax.broadcasted_iota(jnp.int32, (nu, tb), 0) == uid).astype(jnp.bfloat16)
    oh_m = (lax.broadcasted_iota(jnp.int32, (nm, tb), 0) == mid).astype(jnp.bfloat16)
    uembT = jnp.dot(ut_ref[...], oh_u, preferred_element_type=jnp.float32)   # (D, TB)
    membT = jnp.dot(mt_ref[...], oh_m, preferred_element_type=jnp.float32)   # (D, TB)

    prodT = uembT * membT                                # (D, TB) elementwise (VPU)
    m_u = jnp.sum(prodT, axis=0, keepdims=True)          # (1, TB) sublane reduce -> lane-dense
    z = m_u * fc_ref[0] + fc_ref[1]                      # Linear(1, 1)
    out_ref[...] = jax.nn.sigmoid(z)                     # unmasked lane-dense store


def prepare_embedding_tables(u_table, m_table):
    """One-time layout prep (call at model init, NOT per forward):
    transpose to (D, N), pad vocab to a multiple of 128 lanes, cast to bf16."""
    def prep(t):
        n, _ = t.shape
        n_pad = _round_up(n, 128)
        return jnp.pad(t.astype(jnp.float32).T,
                       ((0, 0), (0, n_pad - n))).astype(jnp.bfloat16)
    return prep(u_table), prep(m_table)


@functools.partial(jax.jit, static_argnames=("tile_b",))
def user_movie_forward(x, ut, mt, fc_w, fc_b, *, tile_b=2048):
    """x: (B, 2) int ids. ut/mt: pre-laid-out (D, N_pad) bf16 tables
    from prepare_embedding_tables. Returns (B, 1) float32."""
    B = x.shape[0]
    D = ut.shape[0]
    nu_pad = ut.shape[1]
    nm_pad = mt.shape[1]

    # ---- batch tile selection (all static python math) ----
    b128 = _round_up(B, 128)
    tb = max(128, min(_round_up(tile_b, 128), b128))
    # v7x megacore: guarantee >= 2 grid programs when there is more than one
    # lane-tile of batch, so the "parallel" axis can shard across 2 TCs.
    if b128 > 128:
        tb = min(tb, _round_up(pl.cdiv(b128, 2), 128))
    # VMEM clamp: resident tables + per-batch-lane working set.
    table_bytes = (nu_pad + nm_pad) * D * 2              # bf16, single-buffered
    per_lane_bytes = ((nu_pad + nm_pad) * 2              # bf16 one-hot temporaries
                      + 3 * D * 4                        # uembT/membT/prodT f32
                      + 2 * 2 * 4 + 2 * 1 * 4)           # double-buffered id/out blocks
    budget = 24 * 2**20
    tb_vmem = max(128, ((budget - table_bytes) // per_lane_bytes) // 128 * 128)
    tb = max(128, min(tb, tb_vmem))

    b_pad = _round_up(B, tb)
    grid = (b_pad // tb,)

    vmem_est = table_bytes + per_lane_bytes * tb
    vmem_limit = int(min(64 * 2**20, max(32 * 2**20, 2 * vmem_est)))

    # ---- small per-call input packing (O(B), cheap) ----
    ids = jnp.stack([x[:, 0].astype(jnp.int32), x[:, 1].astype(jnp.int32)], axis=0)
    ids = jnp.pad(ids, ((0, 0), (0, b_pad - B)))          # pad rows gather id 0; sliced off
    fc = jnp.concatenate([fc_w.reshape(-1), fc_b.reshape(-1)]).astype(jnp.float32)  # (2,)

    out = pl.pallas_call(
        _user_movie_kernel,
        out_shape=jax.ShapeDtypeStruct((1, b_pad), jnp.float32),
        grid=grid,
        in_specs=[
            pl.BlockSpec(memory_space=pltpu.MemorySpace.SMEM),   # [w, b] scalars
            pl.BlockSpec((2, tb), lambda i: (0, i)),             # packed ids tile
            pl.BlockSpec(memory_space=pltpu.MemorySpace.VMEM),   # user table (resident)
            pl.BlockSpec(memory_space=pltpu.MemorySpace.VMEM),   # movie table (resident)
        ],
        out_specs=pl.BlockSpec((1, tb), lambda i: (0, i)),       # lane-dense output
        compiler_params=pltpu.CompilerParams(
            dimension_semantics=("parallel",),
            vmem_limit_bytes=vmem_limit),
    )(fc, ids, ut, mt)

    return out[0, :B].reshape(B, 1)


def reference_forward(x, u_table, m_table, fc_w, fc_b):
    uemb = jnp.take(u_table, x[:, 0], axis=0)
    memb = jnp.take(m_table, x[:, 1], axis=0)
    m_u = jnp.sum(uemb * memb, axis=1, keepdims=True)
    return jax.nn.sigmoid(m_u @ fc_w.T + fc_b)


if __name__ == "__main__":
    LEN_USERS = 50
    LEN_MOVIES = 60
    EMBED_DIM = 32
    BATCH = 8

    key = jax.random.PRNGKey(0)
    k_u, k_m, k_w, k_b, k_ids = jax.random.split(key, 5)

    # Deterministic parameter init (synthetic; no checkpoint load).
    u_table = jax.random.normal(k_u, (LEN_USERS, EMBED_DIM), dtype=jnp.float32)
    m_table = jax.random.normal(k_m, (LEN_MOVIES, EMBED_DIM), dtype=jnp.float32)
    fc_w = jax.random.uniform(k_w, (1, 1), minval=-1.0, maxval=1.0, dtype=jnp.float32)
    fc_b = jax.random.uniform(k_b, (1,), minval=-1.0, maxval=1.0, dtype=jnp.float32)

    # Input ids: (B, 2) = [user_id, movie_id] per row.
    user_ids = jax.random.randint(k_ids, (BATCH, 1), 0, LEN_USERS, dtype=jnp.int32)
    movie_ids = jax.random.randint(jax.random.fold_in(k_ids, 1), (BATCH, 1), 0,
                                   LEN_MOVIES, dtype=jnp.int32)
    x = jnp.concatenate([user_ids, movie_ids], axis=1)  # (B, 2) int32

    # One-time table layout (hoisted out of the per-call path).
    ut, mt = prepare_embedding_tables(u_table, m_table)

    out = user_movie_forward(x, ut, mt, fc_w, fc_b)
    out = jax.block_until_ready(out)
    assert out.shape == (BATCH, 1)

    # Exact-precision reference: tables rounded to bf16 (matches kernel storage),
    # everything else in f32.
    u_bf = u_table.astype(jnp.bfloat16).astype(jnp.float32)
    m_bf = m_table.astype(jnp.bfloat16).astype(jnp.float32)
    ref_bf16 = reference_forward(x, u_bf, m_bf, fc_w, fc_b)
    assert jnp.allclose(out, ref_bf16, atol=1e-4, rtol=1e-4), (out, ref_bf16)

    # Loose check against the full-f32 reference (tables live in bf16 in-kernel).
    ref_f32 = reference_forward(x, u_table, m_table, fc_w, fc_b)
    assert jnp.allclose(out, ref_f32, atol=5e-2, rtol=5e-2), (out, ref_f32)

    print("KERNEL_OK")
</pallas_src>

<mosaic_0001>
module attributes {stable_mosaic.version = 11 : i64} {
  func.func @_user_movie_kernel(%arg0: i32, %arg1: memref<2xf32, #tpu.memory_space<smem>>, %arg2: memref<2x128xi32, #tpu.memory_space<vmem>>, %arg3: memref<32x128xbf16, #tpu.memory_space<vmem>>, %arg4: memref<32x128xbf16, #tpu.memory_space<vmem>>, %arg5: memref<1x128xf32, #tpu.memory_space<vmem>>) attributes {dimension_semantics = [#tpu.dimension_semantics<parallel>], iteration_bounds = array<i64: 1>, scalar_prefetch = 0 : i64, scratch_operands = 0 : i64, tpu.core_type = #tpu.core_type<tc>, window_params = [{transform_indices = @transform_0, window_bounds = array<i64: 2>}, {transform_indices = @transform_1, window_bounds = array<i64: 2, 128>}, {pipeline_mode = #tpu.pipeline_mode<synchronous>, transform_indices = @transform_2, window_bounds = array<i64: 32, 128>}, {pipeline_mode = #tpu.pipeline_mode<synchronous>, transform_indices = @transform_3, window_bounds = array<i64: 32, 128>}, {transform_indices = @transform_4, window_bounds = array<i64: 1, 128>}]} {
    %c0 = arith.constant 0 : index
    %c0_0 = arith.constant 0 : index
    %0 = vector.load %arg2[%c0, %c0_0] : memref<2x128xi32, #tpu.memory_space<vmem>>, vector<2x128xi32>
    %1 = vector.extract_strided_slice %0 {offsets = [0, 0], sizes = [1, 128], strides = [1, 1]} : vector<2x128xi32> to vector<1x128xi32>
    %2 = vector.extract_strided_slice %0 {offsets = [1, 0], sizes = [1, 128], strides = [1, 1]} : vector<2x128xi32> to vector<1x128xi32>
    %3 = tpu.iota {dimensions = array<i32: 0>} : vector<128x128xi32>
    %4 = vector.broadcast %1 : vector<1x128xi32> to vector<128x128xi32>
    %5 = arith.cmpi eq, %3, %4 : vector<128x128xi32>
    %6 = arith.extui %5 : vector<128x128xi1> to vector<128x128xi32>
    %7 = arith.sitofp %6 : vector<128x128xi32> to vector<128x128xf32>
    %8 = arith.truncf %7 : vector<128x128xf32> to vector<128x128xbf16>
    %9 = tpu.iota {dimensions = array<i32: 0>} : vector<128x128xi32>
    %10 = vector.broadcast %2 : vector<1x128xi32> to vector<128x128xi32>
    %11 = arith.cmpi eq, %9, %10 : vector<128x128xi32>
    %12 = arith.extui %11 : vector<128x128xi1> to vector<128x128xi32>
    %13 = arith.sitofp %12 : vector<128x128xi32> to vector<128x128xf32>
    %14 = arith.truncf %13 : vector<128x128xf32> to vector<128x128xbf16>
    %c0_1 = arith.constant 0 : index
    %c0_2 = arith.constant 0 : index
    %15 = vector.load %arg3[%c0_1, %c0_2] : memref<32x128xbf16, #tpu.memory_space<vmem>>, vector<32x128xbf16>
    %cst = arith.constant dense<0.000000e+00> : vector<32x128xf32>
    %16 = tpu.matmul %15, %8, %cst {dimension_numbers = #tpu.dot_dimension_numbers<[1], [0], [0], [1], [0, 0, 1, 1], [], []>} : vector<32x128xbf16>, vector<128x128xbf16>, vector<32x128xf32> -> vector<32x128xf32>
    %c0_3 = arith.constant 0 : index
    %c0_4 = arith.constant 0 : index
    %17 = vector.load %arg4[%c0_3, %c0_4] : memref<32x128xbf16, #tpu.memory_space<vmem>>, vector<32x128xbf16>
    %cst_5 = arith.constant dense<0.000000e+00> : vector<32x128xf32>
    %18 = tpu.matmul %17, %14, %cst_5 {dimension_numbers = #tpu.dot_dimension_numbers<[1], [0], [0], [1], [0, 0, 1, 1], [], []>} : vector<32x128xbf16>, vector<128x128xbf16>, vector<32x128xf32> -> vector<32x128xf32>
    %19 = arith.mulf %16, %18 : vector<32x128xf32>
    %cst_6 = arith.constant dense<0.000000e+00> : vector<128xf32>
    %20 = vector.multi_reduction <add>, %19, %cst_6 [0] : vector<32x128xf32> to vector<128xf32>
    %21 = vector.shape_cast %20 : vector<128xf32> to vector<1x128xf32>
    %c0_7 = arith.constant 0 : index
    %22 = memref.load %arg1[%c0_7] : memref<2xf32, #tpu.memory_space<smem>>
    %23 = vector.broadcast %22 : f32 to vector<1x128xf32>
    %24 = arith.mulf %21, %23 : vector<1x128xf32>
    %c1 = arith.constant 1 : index
    %25 = memref.load %arg1[%c1] : memref<2xf32, #tpu.memory_space<smem>>
    %26 = vector.broadcast %25 : f32 to vector<1x128xf32>
    %27 = arith.addf %24, %26 : vector<1x128xf32>
    %28 = arith.negf %27 : vector<1x128xf32>
    %29 = math.exp %28 : vector<1x128xf32>
    %cst_8 = arith.constant 1.000000e+00 : f32
    %30 = vector.broadcast %cst_8 : f32 to vector<1x128xf32>
    %31 = arith.addf %30, %29 : vector<1x128xf32>
    %32 = arith.divf %30, %31 : vector<1x128xf32>
    %c0_9 = arith.constant 0 : index
    %c0_10 = arith.constant 0 : index
    %33 = vector.load %arg5[%c0_9, %c0_10] : memref<1x128xf32, #tpu.memory_space<vmem>>, vector<1x128xf32>
    tpu.vector_store %arg5[%c0_9, %c0_10], %32 {strides = array<i32>} : memref<1x128xf32, #tpu.memory_space<vmem>>, vector<1x128xf32>,
    return
  }
  func.func @transform_0(%arg0: i32) -> i32 {
    %c0_i32 = arith.constant 0 : i32
    %c0_i32_0 = arith.constant 0 : i32
    return %c0_i32 : i32
  }
  func.func @transform_1(%arg0: i32) -> (i32, i32) {
    %c0_i32 = arith.constant 0 : i32
    %c0_i32_0 = arith.constant 0 : i32
    return %c0_i32, %arg0 : i32, i32
  }
  func.func @transform_2(%arg0: i32) -> (i32, i32) {
    %c0_i32 = arith.constant 0 : i32
    %c0_i32_0 = arith.constant 0 : i32
    %c0_i32_1 = arith.constant 0 : i32
    return %c0_i32, %c0_i32_0 : i32, i32
  }
  func.func @transform_3(%arg0: i32) -> (i32, i32) {
    %c0_i32 = arith.constant 0 : i32
    %c0_i32_0 = arith.constant 0 : i32
    %c0_i32_1 = arith.constant 0 : i32
    return %c0_i32, %c0_i32_0 : i32, i32
  }
  func.func @transform_4(%arg0: i32) -> (i32, i32) {
    %c0_i32 = arith.constant 0 : i32
    %c0_i32_0 = arith.constant 0 : i32
    return %c0_i32, %arg0 : i32, i32
  }
}

</mosaic_0001>

<bundles_post_ra>
// kernel: user_movie_forward.1
= control target key start
LH: loop header
LB: loop body
LE: loop exit
PB: predicated region body
PF: predicated region fallthrough
CT: control target
= control target key end

     0   :  { %9 = vsyncpa [#allocation3], 0  ;;  %s689_s0 = inlined_call_operand.vmem [shape: f32[2], index: 0, kind: input, shape index: {}]   ;;  %s690_s1 = inlined_call_operand.vmem [shape: s32[2,128], index: 1, kind: input, shape index: {}]   ;;  %s691_s2 = inlined_call_operand.vmem [shape: bf16[32,128], index: 2, kind: input, shape index: {}]   ;;  %s692_s3 = inlined_call_operand.vmem [shape: bf16[32,128], index: 3, kind: input, shape index: {}]   ;;  %s693_s4 = inlined_call_operand.vmem [shape: f32[1,128], index: 4, kind: output, shape index: {}]  }
   0x1   :  { %s16_s17 = sshll.u32 %s689_s0, 4  ;;  %s17_s17 = int_to_ptr.vmem [resolvable:$true] %s16_s17 }
   0x2   :  { %s470_s18 = scalar_lea.vmem %s17_s17, 16  ;;  %p475_p1 = scmp.lt.s32.totalorder %s17_s17, %s17_s17 }
   0x3   :  { %p471_p0 = scmp.ne.s32.totalorder %s17_s17, %s470_s18  ;;  %p476_p2 = scmp.lt.s32.totalorder %s470_s18, %s470_s18 }
   0x5   :  { %p477_p3 = por %p476_p2, %p475_p1 }
   0x7   :  { %p478_p4 = pnand %p477_p3, %p471_p0 }
   0x9   :  { %481 = shalt.err (!%p478_p4)
}
   0xa   :  { %s484_s19 = smov [#allocation2]  }
   0xb   :  { %19 = dma.vmem_to_smem %s17_s17, 16, %s484_s19, [#allocation3]  }
   0xc   :  { %482 = dma.done.wait [#allocation3], 16  }
   0xd   :  { %483 = vsyncadd [#allocation3], 4294967280 }
   0xe   :  { %29 = sfence }
   0xf   :  { %v32_v0 = vlaneseq  ;;  %v462_v1 = vld [vmem:[%s691_s2] sm:$0xff]   ;;  %v485_v14 = vmov 1.0|1.0   ;;  %v464_v33 = vld [vmem:[%s691_s2 + $0x8] sm:$0xff]   ;;  %s312_s2 = sld [smem:[#allocation2]] }
  0x10   :  { %v463_v3 = vld [vmem:[%s692_s3] sm:$0xff]   ;;  %436 = vmatprep.mubr.bf16.mxu0 %v462_v1  ;;  %v465_v34 = vld [vmem:[%s692_s3 + $0x8] sm:$0xff]   ;;  %s398_s3 = sld [smem:[#allocation2 + $0x1]] }
  0x11   :  { %v517_v2 = vshrl.u32 %v32_v0, 7  ;;  %v31_v4 = vld [vmem:[%s690_s1] sm:$0x3]  ;;  %456 = vmatprep.mubr.bf16.mxu1 %v463_v3 }
  0x13   :  { %v34_v5 = vadd.s32 8, %v517_v2  ;;  %v51_v6 = vsub.s32 0, %v517_v2  ;;  %v111_v7 = vsub.s32 1, %v517_v2  ;;  %v35_v8 = vadd.s32 16, %v517_v2 }
  0x14   :  { %v36_v9 = vadd.s32 24, %v517_v2  ;;  %v37_v12 = vadd.s32 32, %v517_v2  ;;  %v38_v13 = vadd.s32 40, %v517_v2  ;;  %v39_v15 = vadd.s32 48, %v517_v2 }
  0x15   :  { %v530_v10 = vrot.slane %v31_v4, %v51_v6  ;;  %v532_v11 = vrot.slane %v31_v4, %v111_v7  ;;  %v40_v16 = vadd.s32 56, %v517_v2  ;;  %v41_v19 = vadd.s32 64, %v517_v2 }
  0x16   :  { %v42_v20 = vadd.s32 72, %v517_v2  ;;  %v43_v23 = vadd.s32 80, %v517_v2  ;;  %v44_v24 = vadd.s32 88, %v517_v2  ;;  %v45_v27 = vadd.s32 96, %v517_v2 }
  0x17   :  { %vm53_vm0 = vcmp.eq.s32.totalorder %v517_v2, %v530_v10  ;;  %vm54_vm1 = vcmp.eq.s32.totalorder %v34_v5, %v530_v10  ;;  %vm113_vm2 = vcmp.eq.s32.totalorder %v517_v2, %v532_v11  ;;  %vm114_vm3 = vcmp.eq.s32.totalorder %v34_v5, %v532_v11 }
  0x18   :  { %vm364_vm4 = vmpackc.low %vm54_vm1, %vm53_vm0  ;;  %vm55_vm5 = vcmp.eq.s32.totalorder %v35_v8, %v530_v10  ;;  %vm56_vm6 = vcmp.eq.s32.totalorder %v36_v9, %v530_v10  ;;  %vm115_vm7 = vcmp.eq.s32.totalorder %v35_v8, %v532_v11  ;;  %vm116_vm8 = vcmp.eq.s32.totalorder %v36_v9, %v532_v11 }
  0x19   :  { %420 = vmatprep.subr.msk.bf16.mxu0 %vm364_vm4, %v485_v14  ;;  %vm382_vm9 = vmpackc.low %vm114_vm3, %vm113_vm2  ;;  %vm57_vm10 = vcmp.eq.s32.totalorder %v37_v12, %v530_v10  ;;  %vm58_vm11 = vcmp.eq.s32.totalorder %v38_v13, %v530_v10  ;;  %vm117_vm13 = vcmp.eq.s32.totalorder %v37_v12, %v532_v11  ;;  %vm118_vm14 = vcmp.eq.s32.totalorder %v38_v13, %v532_v11 }
  0x1a   :  { %440 = vmatprep.subr.msk.bf16.mxu1 %vm382_vm9, %v485_v14  ;;  %421 = vmatpush3.bf16.msk.msra.mxu0 %vm364_vm4, %v485_v14  ;;  %vm366_vm12 = vmpackc.low %vm56_vm6, %vm55_vm5  ;;  %vm59_vm2 = vcmp.eq.s32.totalorder %v39_v15, %v530_v10  ;;  %vm60_vm3 = vcmp.eq.s32.totalorder %v40_v16, %v530_v10  ;;  %vm119_vm4 = vcmp.eq.s32.totalorder %v39_v15, %v532_v11  ;;  %v46_v28 = vadd.s32 104, %v517_v2 }
  0x1b   :  { %441 = vmatpush3.bf16.msk.msra.mxu1 %vm382_vm9, %v485_v14  ;;  %422 = vmatprep.subr.msk.bf16.mxu0 %vm366_vm12, %v485_v14  ;;  %vm384_vm15 = vmpackc.low %vm116_vm8, %vm115_vm7  ;;  %vm120_vm5 = vcmp.eq.s32.totalorder %v40_v16, %v532_v11  ;;  %vm61_vm8 = vcmp.eq.s32.totalorder %v41_v19, %v530_v10  ;;  %vm62_vm9 = vcmp.eq.s32.totalorder %v42_v20, %v530_v10  ;;  %v47_v31 = vadd.s32 112, %v517_v2 }
  0x1c   :  { %442 = vmatprep.subr.msk.bf16.mxu1 %vm384_vm15, %v485_v14  ;;  %vm562_vm0 = vmpackc.low %vm58_vm11, %vm57_vm10  ;;  %vm121_vm10 = vcmp.eq.s32.totalorder %v41_v19, %v532_v11  ;;  %vm122_vm11 = vcmp.eq.s32.totalorder %v42_v20, %v532_v11  ;;  %v48_v32 = vadd.s32 120, %v517_v2  ;;  %v313_v55 = vstv %s312_s2 }
  0x1d   :  { %vm566_vm1 = vmpackc.low %vm118_vm14, %vm117_vm13  ;;  %vm63_vm14 = vcmp.eq.s32.totalorder %v43_v23, %v530_v10  ;;  %v316_v57 = vstv %s398_s3 }
  0x1e   :  { %423 = vmatpush3.bf16.msk.msra.mxu0 %vm366_vm12, %v485_v14  ;;  %vm584_vm6 = vmpackc.low %vm60_vm3, %vm59_vm2 }
  0x1f   :  { %443 = vmatpush3.bf16.msk.msra.mxu1 %vm384_vm15, %v485_v14  ;;  %424 = vmatprep.subr.msk.bf16.mxu0 %vm562_vm0, %v485_v14  ;;  %vm588_vm7 = vmpackc.low %vm120_vm5, %vm119_vm4  ;;  %vm64_vm15 = vcmp.eq.s32.totalorder %v44_v24, %v530_v10  ;;  %vm65_vm4 = vcmp.eq.s32.totalorder %v45_v27, %v530_v10  ;;  %vm66_vm5 = vcmp.eq.s32.totalorder %v46_v28, %v530_v10 }
  0x20   :  { %444 = vmatprep.subr.msk.bf16.mxu1 %vm566_vm1, %v485_v14  ;;  %vm610_vm12 = vmpackc.low %vm62_vm9, %vm61_vm8 }
  0x21   :  { %vm614_vm13 = vmpackc.low %vm122_vm11, %vm121_vm10  ;;  %vm67_vm10 = vcmp.eq.s32.totalorder %v47_v31, %v530_v10  ;;  %vm68_vm11 = vcmp.eq.s32.totalorder %v48_v32, %v530_v10 }
  0x22   :  { %425 = vmatpush3.bf16.msk.msra.mxu0 %vm562_vm0, %v485_v14  ;;  %vm123_vm0 = vcmp.eq.s32.totalorder %v43_v23, %v532_v11  ;;  %vm636_vm2 = vmpackc.low %vm64_vm15, %vm63_vm14 }
  0x23   :  { %445 = vmatpush3.bf16.msk.msra.mxu1 %vm566_vm1, %v485_v14  ;;  %426 = vmatprep.subr.msk.bf16.mxu0 %vm584_vm6, %v485_v14  ;;  %vm124_vm1 = vcmp.eq.s32.totalorder %v44_v24, %v532_v11  ;;  %vm376_vm8 = vmpackc.low %vm66_vm5, %vm65_vm4 }
  0x24   :  { %446 = vmatprep.subr.msk.bf16.mxu1 %vm588_vm7, %v485_v14  ;;  %vm640_vm3 = vmpackc.low %vm124_vm1, %vm123_vm0 }
  0x25   :  { %vm378_vm14 = vmpackc.low %vm68_vm11, %vm67_vm10 }
  0x26   :  { %427 = vmatpush3.bf16.msk.msra.mxu0 %vm584_vm6, %v485_v14  ;;  %vm125_vm6 = vcmp.eq.s32.totalorder %v45_v27, %v532_v11 }
  0x27   :  { %447 = vmatpush3.bf16.msk.msra.mxu1 %vm588_vm7, %v485_v14  ;;  %428 = vmatprep.subr.msk.bf16.mxu0 %vm610_vm12, %v485_v14  ;;  %vm126_vm7 = vcmp.eq.s32.totalorder %v46_v28, %v532_v11 }
  0x28   :  { %448 = vmatprep.subr.msk.bf16.mxu1 %vm614_vm13, %v485_v14  ;;  %vm394_vm9 = vmpackc.low %vm126_vm7, %vm125_vm6 }
  0x2a   :  { %429 = vmatpush3.bf16.msk.msra.mxu0 %vm610_vm12, %v485_v14  ;;  %vm127_vm12 = vcmp.eq.s32.totalorder %v47_v31, %v532_v11 }
  0x2b   :  { %449 = vmatpush3.bf16.msk.msra.mxu1 %vm614_vm13, %v485_v14  ;;  %430 = vmatprep.subr.msk.bf16.mxu0 %vm636_vm2, %v485_v14  ;;  %vm128_vm13 = vcmp.eq.s32.totalorder %v48_v32, %v532_v11 }
  0x2c   :  { %450 = vmatprep.subr.msk.bf16.mxu1 %vm640_vm3, %v485_v14  ;;  %vm396_vm15 = vmpackc.low %vm128_vm13, %vm127_vm12 }
  0x2e   :  { %431 = vmatpush3.bf16.msk.msra.mxu0 %vm636_vm2, %v485_v14 }
  0x2f   :  { %451 = vmatpush3.bf16.msk.msra.mxu1 %vm640_vm3, %v485_v14  ;;  %432 = vmatprep.subr.msk.bf16.mxu0 %vm376_vm8, %v485_v14 }
  0x30   :  { %452 = vmatprep.subr.msk.bf16.mxu1 %vm394_vm9, %v485_v14 }
  0x32   :  { %433 = vmatpush3.bf16.msk.msra.mxu0 %vm376_vm8, %v485_v14 }
  0x33   :  { %453 = vmatpush3.bf16.msk.msra.mxu1 %vm394_vm9, %v485_v14  ;;  %434 = vmatprep.subr.msk.bf16.mxu0 %vm378_vm14, %v485_v14 }
  0x34   :  { %454 = vmatprep.subr.msk.bf16.mxu1 %vm396_vm15, %v485_v14 }
  0x36   :  { %435 = vmatpush3.bf16.msk.msra.mxu0 %vm378_vm14, %v485_v14 }
  0x37   :  { %455 = vmatpush3.bf16.msk.msra.mxu1 %vm396_vm15, %v485_v14 }
  0x39   :  { %437 = vmatmul.mubr.bf16.vlgmr.msra.gmra.mrb[0].mxu0 %v464_v33 }
  0x3a   :  { %457 = vmatmul.mubr.bf16.vlgmr.msra.gmra.mrb[0].mxu1 %v465_v34 }
 0x10c   :  { %v438_v35 = vpop.f32.mrb[0].mxu0 }
 0x10d   :  { %v458_v36 = vpop.f32.mrb[0].mxu1  ;;  %v219_v37 = vpop.f32.mrb[1].mxu0 }
 0x10e   :  { %v301_v38 = vmul.f32 %v458_v36, %v438_v35  ;;  %v284_v39 = vpop.f32.mrb[1].mxu1  ;;  %v439_v40 = vpop.f32.mrb[2].mxu0 }
 0x10f   :  { %v299_v41 = vmul.f32 %v284_v39, %v219_v37  ;;  %v459_v42 = vpop.f32.mrb[2].mxu1  ;;  %v222_v43 = vpop.f32.mrb[3].mxu0 }
 0x110   :  { %v302_v44 = vmul.f32 %v459_v42, %v439_v40  ;;  %v287_v45 = vpop.f32.mrb[3].mxu1 }
 0x111   :  { %v300_v46 = vmul.f32 %v287_v45, %v222_v43 }
 0x113   :  { %v303_v47 = vadd.f32 %v300_v46, %v299_v41 }
 0x115   :  { %v304_v48 = vadd.f32 %v303_v47, %v301_v38 }
 0x117   :  { %v305_v49 = vadd.f32 %v304_v48, %v302_v44 }
 0x119   :  { %v306_v50 = vrot.slane %v305_v49, 4 }
 0x11b   :  { %v307_v51 = vadd.f32 %v306_v50, %v305_v49 }
 0x11d   :  { %v308_v52 = vrot.slane %v307_v51, 2 }
 0x11f   :  { %v309_v53 = vadd.f32 %v308_v52, %v307_v51 }
 0x121   :  { %v310_v54 = vrot.slane %v309_v53, 1 }
 0x123   :  { %v311_v56 = vadd.f32 %v310_v54, %v309_v53 }
 0x125   :  { %v314_v58 = vmul.f32 %v313_v55, %v311_v56 }
 0x127   :  { %v317_v59 = vadd.f32 %v316_v57, %v314_v58 }
 0x129   :  { %v399_v60 = vmul.f32 -1.442695, %v317_v59 }
 0x12b   :  { %466 = vpow2.f32 %v399_v60 }
 0x135   :  { %v467_v61 = vpop.eup %466 }
 0x136   :  { %v321_v62 = vadd.f32 1.0, %v467_v61 }
 0x138   :  { %468 = vrcp.f32 %v321_v62 }
 0x142   :  { %v469_v63 = vpop.eup %468 }
 0x143   :  { %324 = vst [vmem:[%s693_s4] sm:$0x1] %v469_v63 }
 0x144   :  { %329 = vsyncpa [#allocation3], 1 }

</bundles_post_ra>
